<compile_context>
chip_gen: v5e
topology: v5e:2x2
jax: 0.10.0
libtpu: 0.0.40
codegen_flags: <defaults>
</compile_context>

<pallas_src>
import jax
import jax.numpy as jnp
from jax.experimental import pallas as pl
from jax.experimental.pallas import tpu as pltpu

N_LAYERS = 5
NEG_SLOPE = 0.2


def _leaky_relu(h):
    return jnp.where(h > 0, h, NEG_SLOPE * h)


def dis_latent_code_kernel(x_ref, w0_ref, wrest_ref, b_ref, wf_ref, bf_ref, o_ref):
    # Fused MLP over one (TB, code_dim) batch tile; all weights resident in VMEM.
    h = x_ref[...].astype(jnp.float32)

    # Layer 0 (code_dim -> h_dim): bf16 MXU inputs, f32 accumulation.
    h = jnp.dot(h.astype(jnp.bfloat16), w0_ref[...],
                preferred_element_type=jnp.float32) + b_ref[0]
    h = _leaky_relu(h)

    # Hidden layers 1..N_LAYERS-1 (h_dim -> h_dim), static slices of the stack.
    for i in range(N_LAYERS - 1):
        h = jnp.dot(h.astype(jnp.bfloat16), wrest_ref[i],
                    preferred_element_type=jnp.float32) + b_ref[i + 1]
        h = _leaky_relu(h)

    # Final Linear(h_dim, 1): VPU multiply + lane reduction (no N=1 MXU pass).
    out = jnp.sum(h * wf_ref[...], axis=-1, keepdims=True) + bf_ref[...]
    o_ref[...] = out.astype(o_ref.dtype)


def init_params(key, code_dim, n_layers=N_LAYERS, h_dim=None):
    """PyTorch-Linear-style init (U(-1/sqrt(fan_in), 1/sqrt(fan_in))).
    Weights stored as (in_features, out_features)."""
    if h_dim is None:
        h_dim = code_dim
    params = []
    prev = code_dim
    dims = [(prev if i == 0 else h_dim, h_dim) for i in range(n_layers)]
    dims.append((h_dim, 1))
    for (fan_in, fan_out) in dims:
        key, kw, kb = jax.random.split(key, 3)
        bound = 1.0 / jnp.sqrt(jnp.float32(fan_in))
        w = jax.random.uniform(kw, (fan_in, fan_out), jnp.float32, -bound, bound)
        b = jax.random.uniform(kb, (1, fan_out), jnp.float32, -bound, bound)
        params.append((w, b))
    return params


def dis_latent_code_forward(x, params):
    """x: any shape (B, ...) — flattened to (B, code_dim) like x.view(B, -1)."""
    B = x.shape[0]
    x2d = x.reshape(B, -1).astype(jnp.float32)
    code_dim = x2d.shape[1]

    (w0, _b0) = params[0]
    hidden = params[1:N_LAYERS]
    (wf, bf) = params[N_LAYERS]
    h_dim = w0.shape[1]

    # ---- Pack parameters (13 operands -> 6), bf16 weights for the MXU. ----
    w0_p = w0.astype(jnp.bfloat16)                                      # (code_dim, h_dim)
    wrest = jnp.stack([w for (w, _) in hidden]).astype(jnp.bfloat16)    # (N_LAYERS-1, h_dim, h_dim)
    b_all = jnp.stack([b for (_, b) in params[:N_LAYERS]]).astype(jnp.float32)  # (N_LAYERS, 1, h_dim)
    wf_row = wf.reshape(1, h_dim).astype(jnp.float32)                   # (1, h_dim) lane-dense
    bf2d = bf.reshape(1, 1).astype(jnp.float32)                         # (1, 1)

    # Batch tiling: full batch for small B; 128-row tiles (sublane-aligned)
    # once B grows.  Rows are independent, so a ragged trailing tile is safe.
    TB = B if B <= 128 else 128
    grid = (pl.cdiv(B, TB),)

    out = pl.pallas_call(
        dis_latent_code_kernel,
        out_shape=jax.ShapeDtypeStruct((B, 1), jnp.float32),
        grid=grid,
        in_specs=[
            pl.BlockSpec((TB, code_dim), lambda i: (i, 0)),              # x tile
            pl.BlockSpec((code_dim, h_dim), lambda i: (0, 0)),           # w0 (resident)
            pl.BlockSpec((N_LAYERS - 1, h_dim, h_dim), lambda i: (0, 0, 0)),  # stacked hidden W
            pl.BlockSpec((N_LAYERS, 1, h_dim), lambda i: (0, 0, 0)),     # stacked biases
            pl.BlockSpec((1, h_dim), lambda i: (0, 0)),                  # final weight row
            pl.BlockSpec((1, 1), lambda i: (0, 0)),                      # final bias
        ],
        out_specs=pl.BlockSpec((TB, 1), lambda i: (i, 0)),
        compiler_params=pltpu.CompilerParams(
            dimension_semantics=("parallel",)),
    )(x2d, w0_p, wrest, b_all, wf_row, bf2d)
    return out


def dis_latent_code_ref(x, params):
    """Pure-JAX reference matching the kernel's numerics (bf16 dot inputs,
    f32 accumulation / elementwise)."""
    B = x.shape[0]
    h = x.reshape(B, -1).astype(jnp.float32)
    for i, (w, b) in enumerate(params):
        if i < N_LAYERS:
            h = jnp.dot(h.astype(jnp.bfloat16), w.astype(jnp.bfloat16),
                        preferred_element_type=jnp.float32) + b
            h = jnp.where(h > 0, h, NEG_SLOPE * h)
        else:
            h = jnp.sum(h * w.reshape(1, -1), axis=-1, keepdims=True) + b.reshape(1, 1)
    return h


if __name__ == "__main__":
    key = jax.random.PRNGKey(0)
    kx, kp = jax.random.split(key)

    B, code_dim, h_dim = 8, 32, 32
    x = jax.random.normal(kx, (B, code_dim), jnp.float32)

    params = init_params(kp, code_dim, n_layers=N_LAYERS, h_dim=h_dim)

    out = dis_latent_code_forward(x, params)
    out = jax.block_until_ready(out)

    ref = dis_latent_code_ref(x, params)
    assert out.shape == (B, 1), out.shape
    assert jnp.allclose(out, ref, atol=2e-3, rtol=2e-3), (out, ref)

    print("KERNEL_OK")
</pallas_src>

<mosaic_0001>
module attributes {stable_mosaic.version = 11 : i64} {
  func.func @dis_latent_code_kernel(%arg0: i32, %arg1: memref<8x32xf32, #tpu.memory_space<vmem>>, %arg2: memref<32x32xbf16, #tpu.memory_space<vmem>>, %arg3: memref<4x32x32xbf16, #tpu.memory_space<vmem>>, %arg4: memref<5x1x32xf32, #tpu.memory_space<vmem>>, %arg5: memref<1x32xf32, #tpu.memory_space<vmem>>, %arg6: memref<1x1xf32, #tpu.memory_space<vmem>>, %arg7: memref<8x1xf32, #tpu.memory_space<vmem>>) attributes {dimension_semantics = [#tpu.dimension_semantics<parallel>], iteration_bounds = array<i64: 1>, scalar_prefetch = 0 : i64, scratch_operands = 0 : i64, tpu.core_type = #tpu.core_type<tc>, window_params = [{transform_indices = @transform_0, window_bounds = array<i64: 8, 32>}, {pipeline_mode = #tpu.pipeline_mode<synchronous>, transform_indices = @transform_1, window_bounds = array<i64: 32, 32>}, {pipeline_mode = #tpu.pipeline_mode<synchronous>, transform_indices = @transform_2, window_bounds = array<i64: 4, 32, 32>}, {pipeline_mode = #tpu.pipeline_mode<synchronous>, transform_indices = @transform_3, window_bounds = array<i64: 5, 1, 32>}, {pipeline_mode = #tpu.pipeline_mode<synchronous>, transform_indices = @transform_4, window_bounds = array<i64: 1, 32>}, {pipeline_mode = #tpu.pipeline_mode<synchronous>, transform_indices = @transform_5, window_bounds = array<i64: 1, 1>}, {transform_indices = @transform_6, window_bounds = array<i64: 8, 1>}]} {
    %c0 = arith.constant 0 : index
    %c0_0 = arith.constant 0 : index
    %0 = vector.load %arg1[%c0, %c0_0] : memref<8x32xf32, #tpu.memory_space<vmem>>, vector<8x32xf32>
    %1 = arith.truncf %0 : vector<8x32xf32> to vector<8x32xbf16>
    %c0_1 = arith.constant 0 : index
    %c0_2 = arith.constant 0 : index
    %2 = vector.load %arg2[%c0_1, %c0_2] : memref<32x32xbf16, #tpu.memory_space<vmem>>, vector<32x32xbf16>
    %cst = arith.constant dense<0.000000e+00> : vector<8x32xf32>
    %3 = tpu.matmul %1, %2, %cst {dimension_numbers = #tpu.dot_dimension_numbers<[1], [0], [0], [1], [0, 0, 1, 1], [], []>} : vector<8x32xbf16>, vector<32x32xbf16>, vector<8x32xf32> -> vector<8x32xf32>
    %c0_3 = arith.constant 0 : index
    %c0_4 = arith.constant 0 : index
    %c0_5 = arith.constant 0 : index
    %4 = vector.load %arg4[%c0_3, %c0_4, %c0_5] : memref<5x1x32xf32, #tpu.memory_space<vmem>>, vector<1x1x32xf32>
    %5 = vector.shape_cast %4 : vector<1x1x32xf32> to vector<1x32xf32>
    %6 = vector.broadcast %5 : vector<1x32xf32> to vector<8x32xf32>
    %7 = arith.addf %3, %6 : vector<8x32xf32>
    %cst_6 = arith.constant 0.000000e+00 : f32
    %8 = vector.broadcast %cst_6 : f32 to vector<8x32xf32>
    %9 = arith.cmpf ogt, %7, %8 : vector<8x32xf32>
    %cst_7 = arith.constant 2.000000e-01 : f32
    %10 = vector.broadcast %cst_7 : f32 to vector<8x32xf32>
    %11 = arith.mulf %10, %7 : vector<8x32xf32>
    %12 = arith.select %9, %7, %11 : vector<8x32xi1>, vector<8x32xf32>
    %13 = arith.truncf %12 : vector<8x32xf32> to vector<8x32xbf16>
    %c0_8 = arith.constant 0 : index
    %c0_9 = arith.constant 0 : index
    %c0_10 = arith.constant 0 : index
    %14 = vector.load %arg3[%c0_8, %c0_9, %c0_10] : memref<4x32x32xbf16, #tpu.memory_space<vmem>>, vector<1x32x32xbf16>
    %15 = vector.shape_cast %14 : vector<1x32x32xbf16> to vector<32x32xbf16>
    %cst_11 = arith.constant dense<0.000000e+00> : vector<8x32xf32>
    %16 = tpu.matmul %13, %15, %cst_11 {dimension_numbers = #tpu.dot_dimension_numbers<[1], [0], [0], [1], [0, 0, 1, 1], [], []>} : vector<8x32xbf16>, vector<32x32xbf16>, vector<8x32xf32> -> vector<8x32xf32>
    %c1 = arith.constant 1 : index
    %c0_12 = arith.constant 0 : index
    %c0_13 = arith.constant 0 : index
    %17 = vector.load %arg4[%c1, %c0_12, %c0_13] : memref<5x1x32xf32, #tpu.memory_space<vmem>>, vector<1x1x32xf32>
    %18 = vector.shape_cast %17 : vector<1x1x32xf32> to vector<1x32xf32>
    %19 = vector.broadcast %18 : vector<1x32xf32> to vector<8x32xf32>
    %20 = arith.addf %16, %19 : vector<8x32xf32>
    %cst_14 = arith.constant 0.000000e+00 : f32
    %21 = vector.broadcast %cst_14 : f32 to vector<8x32xf32>
    %22 = arith.cmpf ogt, %20, %21 : vector<8x32xf32>
    %cst_15 = arith.constant 2.000000e-01 : f32
    %23 = vector.broadcast %cst_15 : f32 to vector<8x32xf32>
    %24 = arith.mulf %23, %20 : vector<8x32xf32>
    %25 = arith.select %22, %20, %24 : vector<8x32xi1>, vector<8x32xf32>
    %26 = arith.truncf %25 : vector<8x32xf32> to vector<8x32xbf16>
    %c1_16 = arith.constant 1 : index
    %c0_17 = arith.constant 0 : index
    %c0_18 = arith.constant 0 : index
    %27 = vector.load %arg3[%c1_16, %c0_17, %c0_18] : memref<4x32x32xbf16, #tpu.memory_space<vmem>>, vector<1x32x32xbf16>
    %28 = vector.shape_cast %27 : vector<1x32x32xbf16> to vector<32x32xbf16>
    %cst_19 = arith.constant dense<0.000000e+00> : vector<8x32xf32>
    %29 = tpu.matmul %26, %28, %cst_19 {dimension_numbers = #tpu.dot_dimension_numbers<[1], [0], [0], [1], [0, 0, 1, 1], [], []>} : vector<8x32xbf16>, vector<32x32xbf16>, vector<8x32xf32> -> vector<8x32xf32>
    %c2 = arith.constant 2 : index
    %c0_20 = arith.constant 0 : index
    %c0_21 = arith.constant 0 : index
    %30 = vector.load %arg4[%c2, %c0_20, %c0_21] : memref<5x1x32xf32, #tpu.memory_space<vmem>>, vector<1x1x32xf32>
    %31 = vector.shape_cast %30 : vector<1x1x32xf32> to vector<1x32xf32>
    %32 = vector.broadcast %31 : vector<1x32xf32> to vector<8x32xf32>
    %33 = arith.addf %29, %32 : vector<8x32xf32>
    %cst_22 = arith.constant 0.000000e+00 : f32
    %34 = vector.broadcast %cst_22 : f32 to vector<8x32xf32>
    %35 = arith.cmpf ogt, %33, %34 : vector<8x32xf32>
    %cst_23 = arith.constant 2.000000e-01 : f32
    %36 = vector.broadcast %cst_23 : f32 to vector<8x32xf32>
    %37 = arith.mulf %36, %33 : vector<8x32xf32>
    %38 = arith.select %35, %33, %37 : vector<8x32xi1>, vector<8x32xf32>
    %39 = arith.truncf %38 : vector<8x32xf32> to vector<8x32xbf16>
    %c2_24 = arith.constant 2 : index
    %c0_25 = arith.constant 0 : index
    %c0_26 = arith.constant 0 : index
    %40 = vector.load %arg3[%c2_24, %c0_25, %c0_26] : memref<4x32x32xbf16, #tpu.memory_space<vmem>>, vector<1x32x32xbf16>
    %41 = vector.shape_cast %40 : vector<1x32x32xbf16> to vector<32x32xbf16>
    %cst_27 = arith.constant dense<0.000000e+00> : vector<8x32xf32>
    %42 = tpu.matmul %39, %41, %cst_27 {dimension_numbers = #tpu.dot_dimension_numbers<[1], [0], [0], [1], [0, 0, 1, 1], [], []>} : vector<8x32xbf16>, vector<32x32xbf16>, vector<8x32xf32> -> vector<8x32xf32>
    %c3 = arith.constant 3 : index
    %c0_28 = arith.constant 0 : index
    %c0_29 = arith.constant 0 : index
    %43 = vector.load %arg4[%c3, %c0_28, %c0_29] : memref<5x1x32xf32, #tpu.memory_space<vmem>>, vector<1x1x32xf32>
    %44 = vector.shape_cast %43 : vector<1x1x32xf32> to vector<1x32xf32>
    %45 = vector.broadcast %44 : vector<1x32xf32> to vector<8x32xf32>
    %46 = arith.addf %42, %45 : vector<8x32xf32>
    %cst_30 = arith.constant 0.000000e+00 : f32
    %47 = vector.broadcast %cst_30 : f32 to vector<8x32xf32>
    %48 = arith.cmpf ogt, %46, %47 : vector<8x32xf32>
    %cst_31 = arith.constant 2.000000e-01 : f32
    %49 = vector.broadcast %cst_31 : f32 to vector<8x32xf32>
    %50 = arith.mulf %49, %46 : vector<8x32xf32>
    %51 = arith.select %48, %46, %50 : vector<8x32xi1>, vector<8x32xf32>
    %52 = arith.truncf %51 : vector<8x32xf32> to vector<8x32xbf16>
    %c3_32 = arith.constant 3 : index
    %c0_33 = arith.constant 0 : index
    %c0_34 = arith.constant 0 : index
    %53 = vector.load %arg3[%c3_32, %c0_33, %c0_34] : memref<4x32x32xbf16, #tpu.memory_space<vmem>>, vector<1x32x32xbf16>
    %54 = vector.shape_cast %53 : vector<1x32x32xbf16> to vector<32x32xbf16>
    %cst_35 = arith.constant dense<0.000000e+00> : vector<8x32xf32>
    %55 = tpu.matmul %52, %54, %cst_35 {dimension_numbers = #tpu.dot_dimension_numbers<[1], [0], [0], [1], [0, 0, 1, 1], [], []>} : vector<8x32xbf16>, vector<32x32xbf16>, vector<8x32xf32> -> vector<8x32xf32>
    %c4 = arith.constant 4 : index
    %c0_36 = arith.constant 0 : index
    %c0_37 = arith.constant 0 : index
    %56 = vector.load %arg4[%c4, %c0_36, %c0_37] : memref<5x1x32xf32, #tpu.memory_space<vmem>>, vector<1x1x32xf32>
    %57 = vector.shape_cast %56 : vector<1x1x32xf32> to vector<1x32xf32>
    %58 = vector.broadcast %57 : vector<1x32xf32> to vector<8x32xf32>
    %59 = arith.addf %55, %58 : vector<8x32xf32>
    %cst_38 = arith.constant 0.000000e+00 : f32
    %60 = vector.broadcast %cst_38 : f32 to vector<8x32xf32>
    %61 = arith.cmpf ogt, %59, %60 : vector<8x32xf32>
    %cst_39 = arith.constant 2.000000e-01 : f32
    %62 = vector.broadcast %cst_39 : f32 to vector<8x32xf32>
    %63 = arith.mulf %62, %59 : vector<8x32xf32>
    %64 = arith.select %61, %59, %63 : vector<8x32xi1>, vector<8x32xf32>
    %c0_40 = arith.constant 0 : index
    %c0_41 = arith.constant 0 : index
    %65 = vector.load %arg5[%c0_40, %c0_41] : memref<1x32xf32, #tpu.memory_space<vmem>>, vector<1x32xf32>
    %66 = vector.broadcast %65 : vector<1x32xf32> to vector<8x32xf32>
    %67 = arith.mulf %64, %66 : vector<8x32xf32>
    %cst_42 = arith.constant dense<0.000000e+00> : vector<8xf32>
    %68 = vector.multi_reduction <add>, %67, %cst_42 [1] : vector<8x32xf32> to vector<8xf32>
    %69 = vector.shape_cast %68 : vector<8xf32> to vector<8x1xf32>
    %c0_43 = arith.constant 0 : index
    %c0_44 = arith.constant 0 : index
    %70 = vector.load %arg6[%c0_43, %c0_44] : memref<1x1xf32, #tpu.memory_space<vmem>>, vector<1x1xf32>
    %71 = vector.broadcast %70 : vector<1x1xf32> to vector<8x1xf32>
    %72 = arith.addf %69, %71 : vector<8x1xf32>
    %c0_45 = arith.constant 0 : index
    %c0_46 = arith.constant 0 : index
    %73 = vector.load %arg7[%c0_45, %c0_46] : memref<8x1xf32, #tpu.memory_space<vmem>>, vector<8x1xf32>
    tpu.vector_store %arg7[%c0_45, %c0_46], %72 {strides = array<i32>} : memref<8x1xf32, #tpu.memory_space<vmem>>, vector<8x1xf32>,
    return
  }
  func.func @transform_0(%arg0: i32) -> (i32, i32) {
    %c0_i32 = arith.constant 0 : i32
    %c0_i32_0 = arith.constant 0 : i32
    return %arg0, %c0_i32 : i32, i32
  }
  func.func @transform_1(%arg0: i32) -> (i32, i32) {
    %c0_i32 = arith.constant 0 : i32
    %c0_i32_0 = arith.constant 0 : i32
    %c0_i32_1 = arith.constant 0 : i32
    return %c0_i32, %c0_i32_0 : i32, i32
  }
  func.func @transform_2(%arg0: i32) -> (i32, i32, i32) {
    %c0_i32 = arith.constant 0 : i32
    %c0_i32_0 = arith.constant 0 : i32
    %c0_i32_1 = arith.constant 0 : i32
    %c0_i32_2 = arith.constant 0 : i32
    return %c0_i32, %c0_i32_0, %c0_i32_1 : i32, i32, i32
  }
  func.func @transform_3(%arg0: i32) -> (i32, i32, i32) {
    %c0_i32 = arith.constant 0 : i32
    %c0_i32_0 = arith.constant 0 : i32
    %c0_i32_1 = arith.constant 0 : i32
    %c0_i32_2 = arith.constant 0 : i32
    return %c0_i32, %c0_i32_0, %c0_i32_1 : i32, i32, i32
  }
  func.func @transform_4(%arg0: i32) -> (i32, i32) {
    %c0_i32 = arith.constant 0 : i32
    %c0_i32_0 = arith.constant 0 : i32
    %c0_i32_1 = arith.constant 0 : i32
    return %c0_i32, %c0_i32_0 : i32, i32
  }
  func.func @transform_5(%arg0: i32) -> (i32, i32) {
    %c0_i32 = arith.constant 0 : i32
    %c0_i32_0 = arith.constant 0 : i32
    %c0_i32_1 = arith.constant 0 : i32
    return %c0_i32, %c0_i32_0 : i32, i32
  }
  func.func @transform_6(%arg0: i32) -> (i32, i32) {
    %c0_i32 = arith.constant 0 : i32
    %c0_i32_0 = arith.constant 0 : i32
    return %arg0, %c0_i32 : i32, i32
  }
}

</mosaic_0001>

<bundles_post_ra>
// kernel: tpu_custom_call.1
= control target key start
LH: loop header
LB: loop body
LE: loop exit
PB: predicated region body
PF: predicated region fallthrough
CT: control target
= control target key end

     0   :  { %s560_s0 = inlined_call_operand.hbm [shape: f32[8,32], index: 0, kind: input, shape index: {}]   ;;  %s561_s1 = inlined_call_operand.hbm [shape: bf16[32,32], index: 1, kind: input, shape index: {}]   ;;  %s562_s2 = inlined_call_operand.hbm [shape: bf16[4,32,32], index: 2, kind: input, shape index: {}]   ;;  %s563_s3 = inlined_call_operand.hbm [shape: f32[5,1,32], index: 3, kind: input, shape index: {}]   ;;  %s564_s4 = inlined_call_operand.vmem [shape: f32[1,32], index: 4, kind: input, shape index: {}]   ;;  %s565_s5 = inlined_call_operand.<no memory space> [shape: f32[1,1], index: 5, kind: input, shape index: {}]   ;;  %s566_s6 = inlined_call_operand.vmem [shape: f32[8,1], index: 6, kind: output, shape index: {}]  }
   0x1   :  { %v11_v0 = vstv %s565_s5 }
   0x2   :  { %12 = vst [vmem:[#allocation2] sm:$0x1] %v11_v0 }
   0x3   :  { %13 = vsyncpa [#allocation4], 0 }
   0x4   :  { %14 = vsyncpa [#allocation6], 0  ;;  %s31_s25 = sshll.u32 %s561_s1, 4  ;;  %s32_s25 = int_to_ptr.hbm [resolvable:$true] %s31_s25 }
   0x5   :  { %15 = vsyncpa [#allocation9], 0  ;;  %s490_s26 = smov [#allocation5]   ;;  %s21_s30 = sshll.u32 %s560_s0, 4  ;;  %s22_s30 = int_to_ptr.hbm [resolvable:$true] %s21_s30 }
   0x6   :  { %s33_s27 = sshll.u32 %s490_s26, 4  ;;  %s491_s7 = smov 64   ;;  %s34_s27 = int_to_ptr.vmem [resolvable:$true] %s33_s27 }
   0x7   :  { %s492_s8 = smov 4   ;;  %s493_s5 = smov [#allocation3]  }
   0x8   :  { %39 = dma.hbm_to_vmem [thread:$0]  %s32_s25, 256, %s34_s27, [#allocation6], %s491_s7, %s491_s7, %s492_s8  }
   0x9   :  { %s23_s9 = sshll.u32 %s493_s5, 4  ;;  %s44_s12 = sshll.u32 %s562_s2, 4  ;;  %s24_s9 = int_to_ptr.vmem [resolvable:$true] %s23_s9  ;;  %s45_s12 = int_to_ptr.hbm [resolvable:$true] %s44_s12 }
   0xa   :  { %26 = dma.hbm_to_vmem [thread:$0]  %s22_s30, 128, %s24_s9, [#allocation4]  }
   0xb   :  { %s57_s14 = sshll.u32 %s563_s3, 4  ;;  %s494_s15 = smov [#allocation7]   ;;  %s58_s14 = int_to_ptr.hbm [resolvable:$true] %s57_s14 }
   0xc   :  { %s46_s16 = sshll.u32 %s494_s15, 4  ;;  %s495_s0 = smov [#allocation8]   ;;  %s47_s16 = int_to_ptr.vmem [resolvable:$true] %s46_s16 }
   0xd   :  { %52 = dma.hbm_to_vmem [thread:$0]  %s45_s12, 1024, %s47_s16, [#allocation6], %s491_s7, %s491_s7, %s492_s8  }
   0xe   :  { %s59_s17 = sshll.u32 %s495_s0, 4  ;;  %s496_s18 = smov 16   ;;  %s60_s17 = int_to_ptr.vmem [resolvable:$true] %s59_s17 }
   0xf   :  { %s497_s19 = smov 1  }
  0x10   :  { %65 = dma.hbm_to_vmem [thread:$0]  %s58_s14, 80, %s60_s17, [#allocation9], %s496_s18, %s496_s18, %s497_s19  }
  0x11   :  { %484 = dma.done.wait [#allocation4], 128  }
  0x12   :  { %485 = vsyncadd [#allocation4], 4294967168 }
  0x13   :  { %486 = dma.done.wait [#allocation6], 1280  }
  0x14   :  { %487 = vsyncadd [#allocation6], 4294966016 }
  0x15   :  { %488 = dma.done.wait [#allocation9], 80  }
  0x16   :  { %489 = vsyncadd [#allocation9], 4294967216  ;;  %v364_v1 = vld [vmem:[#allocation5 + $0x8] sm:$0xff]  ;;  %v363_v2 = vld [vmem:[#allocation5] sm:$0xff]  ;;  %vm109_vm0 = vcmask 261120   ;;  %vm309_vm6 = vcmask 7168  }
  0x17   :  { %v87_v3 = vld [vmem:[#allocation3] sm:$0xff]  ;;  %119 = vmatpush.bf16.msra.mxu0 %v364_v1  ;;  %v365_v6 = vld [vmem:[#allocation7] sm:$0xff]  ;;  %v368_v14 = vld [vmem:[#allocation7 + $0x18] sm:$0xff] }
  0x18   :  { %v88_v4 = vpack.c.bf16 %v87_v3, %v87_v3  ;;  %v366_v5 = vld [vmem:[#allocation7 + $0x8] sm:$0xff]  ;;  %v381_v7 = vld [vmem:[#allocation8] ss:$0 sm:$0xff]  ;;  %202 = vmatpush.bf16.msra.mxu2 %v368_v14  ;;  %v367_v15 = vld [vmem:[#allocation7 + $0x10] sm:$0xff] }
  0x19   :  { %160 = vmatpush.bf16.msra.mxu1 %v366_v5  ;;  %v382_v16 = vld [vmem:[#allocation8 + $0x1] ss:$0 sm:$0xff]  ;;  %v370_v23 = vld [vmem:[#allocation7 + $0x28] sm:$0xff]  ;;  %v372_v25 = vld [vmem:[#allocation7 + $0x38] sm:$0xff] }
  0x1a   :  { %244 = vmatpush.bf16.msra.mxu3 %v370_v23  ;;  %v369_v24 = vld [vmem:[#allocation7 + $0x20] sm:$0xff]  ;;  %v371_v33 = vld [vmem:[#allocation7 + $0x30] sm:$0xff] }
  0x1b   :  { %120 = vmatpush.bf16.msra.mxu0 %v363_v2  ;;  %v383_v26 = vld [vmem:[#allocation8 + $0x2] ss:$0 sm:$0xff]  ;;  %v384_v34 = vld [vmem:[#allocation8 + $0x3] ss:$0 sm:$0xff]  ;;  %v385_v41 = vld [vmem:[#allocation8 + $0x4] ss:$0 sm:$0xff] }
  0x1c   :  { %203 = vmatpush.bf16.msra.mxu2 %v367_v15  ;;  %v386_v44 = vld [vmem:[%s564_s4] ss:$0 sm:$0xff] }
  0x1d   :  { %161 = vmatpush.bf16.msra.mxu1 %v365_v6  ;;  %v387_v50 = vld [vmem:[#allocation2] ss:$0 sm:$0xff] }
  0x1e   :  { %326 = vmatmul.msk.bf16.vlgmr.msra.gmra.mxu0 %vm109_vm0, %v88_v4  ;;  %245 = vmatpush.bf16.msra.mxu3 %v369_v24 }
  0x1f   :  { %286 = vmatpush.bf16.msrb.mxu0 %v372_v25 }
  0x23   :  { %287 = vmatpush.bf16.msrb.mxu0 %v371_v33 }
  0x9b   :  { %v122_v8 = vpop.f32.mrf.mxu0 }
  0x9c   :  { %v123_v9 = vadd.f32 %v381_v7, %v122_v8 }
  0x9e   :  { %vm126_vm1 = vcmp.gt.f32.partialorder %v123_v9, 0.0  ;;  %v127_v10 = vmul.f32 0.2, %v123_v9 }
  0xa0   :  { %v128_v11 = vsel %vm126_vm1, %v123_v9, %v127_v10 }
  0xa1   :  { %v129_v12 = vpack.c.bf16 %v128_v11, %v128_v11 }
  0xa3   :  { %v124_v13 = vpop.f32.mrf.mxu0  ;;  %335 = vmatmul.msk.bf16.vlgmr.msra.gmra.mxu1 %vm109_vm0, %v129_v12 }
 0x120   :  { %v163_v17 = vpop.f32.mrf.mxu1 }
 0x121   :  { %v164_v18 = vadd.f32 %v382_v16, %v163_v17 }
 0x123   :  { %vm167_vm2 = vcmp.gt.f32.partialorder %v164_v18, 0.0  ;;  %v168_v19 = vmul.f32 0.2, %v164_v18 }
 0x125   :  { %v169_v20 = vsel %vm167_vm2, %v164_v18, %v168_v19 }
 0x126   :  { %v170_v21 = vpack.c.bf16 %v169_v20, %v169_v20 }
 0x128   :  { %v165_v22 = vpop.f32.mrf.mxu1  ;;  %344 = vmatmul.msk.bf16.vlgmr.msra.gmra.mxu2 %vm109_vm0, %v170_v21 }
 0x1ab   :  { %v205_v27 = vpop.f32.mrf.mxu2 }
 0x1ac   :  { %v206_v28 = vadd.f32 %v383_v26, %v205_v27 }
 0x1ae   :  { %vm209_vm3 = vcmp.gt.f32.partialorder %v206_v28, 0.0  ;;  %v210_v29 = vmul.f32 0.2, %v206_v28 }
 0x1b0   :  { %v211_v30 = vsel %vm209_vm3, %v206_v28, %v210_v29 }
 0x1b1   :  { %v212_v31 = vpack.c.bf16 %v211_v30, %v211_v30 }
 0x1b3   :  { %v207_v32 = vpop.f32.mrf.mxu2  ;;  %353 = vmatmul.msk.bf16.vlgmr.msra.gmra.mxu3 %vm109_vm0, %v212_v31 }
 0x236   :  { %v247_v35 = vpop.f32.mrf.mxu3 }
 0x237   :  { %v248_v36 = vadd.f32 %v384_v34, %v247_v35 }
 0x239   :  { %vm251_vm4 = vcmp.gt.f32.partialorder %v248_v36, 0.0  ;;  %v252_v37 = vmul.f32 0.2, %v248_v36 }
 0x23b   :  { %v253_v38 = vsel %vm251_vm4, %v248_v36, %v252_v37 }
 0x23c   :  { %v254_v39 = vpack.c.bf16 %v253_v38, %v253_v38 }
 0x23e   :  { %v249_v40 = vpop.f32.mrf.mxu3  ;;  %362 = vmatmul.msk.bf16.vlgmr.msrb.gmra.mxu0 %vm109_vm0, %v254_v39 }
 0x2bb   :  { %v289_v42 = vpop.f32.mrf.mxu0 }
 0x2bc   :  { %v290_v43 = vadd.f32 %v385_v41, %v289_v42 }
 0x2be   :  { %v294_v45 = vmul.f32 0.2, %v290_v43  ;;  %vm293_vm5 = vcmp.gt.f32.partialorder %v290_v43, 0.0 }
 0x2c0   :  { %v295_v46 = vsel %vm293_vm5, %v290_v43, %v294_v45 }
 0x2c1   :  { %v300_v47 = vmul.f32 %v386_v44, %v295_v46 }
 0x2c3   :  { %v291_v48 = vpop.f32.mrf.mxu0  ;;  %v301_v49 = vsel %vm109_vm0, %v300_v47, 0.0 }
 0x2c4   :  { %302 = vadd.xlane.f32.xlu0 %v301_v49 }
 0x337   :  { %v303_v51 = vpop.xlane.xlu0 %302 }
 0x338   :  { %v308_v52 = vadd.f32 %v387_v50, %v303_v51 }
 0x33a   :  { %310 = vst.msk [vmem:[%s566_s6] sm:$0xff] %vm309_vm6, %v308_v52 }
 0x33b   :  { %315 = vsyncpa [#allocation4], 1 }
 0x33c   :  { %316 = vsyncpa [#allocation6], 1 }
 0x33d   :  { %317 = vsyncpa [#allocation9], 1 }

</bundles_post_ra>
